<compile_context>
chip_gen: v7x
topology: tpu7x:2x2x1
jax: 0.10.0
libtpu: 0.0.40
codegen_flags: <defaults>
</compile_context>

<pallas_src>
import jax
import jax.numpy as jnp
from jax.experimental import pallas as pl
from jax.experimental.pallas import tpu as pltpu

D_IN = 196          # 14 * 14
D_H = 128
D_Z = 8
D_Z2 = 2 * D_Z      # fused [mu | std] width


def _round_up(n, m):
    return ((n + m - 1) // m) * m


def _vae_kernel(x_ref, eps_ref,
                w1_ref, b1_ref,
                wh_ref, bh_ref,
                w3_ref, b3_ref,
                w4_ref, b4_ref,
                recon_ref, head_ref):
    cd = w1_ref.dtype                     # compute dtype of matmul inputs (f32 or bf16)
    x = x_ref[...].astype(cd)             # (T, 196) f32 from HBM, cast in-kernel

    # encoder: h = tanh(x @ W1 + b1)   (bias add + tanh in f32)
    h = jnp.tanh(
        jnp.dot(x, w1_ref[...], preferred_element_type=jnp.float32) + b1_ref[...]
    )                                     # (T, 128) f32

    # fused head: [mu | std] = h @ [W21 | W22] + [b21 | b22]
    head = (jnp.dot(h.astype(cd), wh_ref[...], preferred_element_type=jnp.float32)
            + bh_ref[...])                # (T, 16) f32
    mu = head[:, :D_Z]
    std = head[:, D_Z:]

    # sampling: 0.5*(eps1*std + mu + (eps2*std + mu)) == mu + 0.5*(eps1+eps2)*std
    z = mu + 0.5 * eps_ref[...] * std     # (T, 8) f32

    # decoder: sigmoid(tanh(z @ W3 + b3) @ W4 + b4)
    h2 = jnp.tanh(
        jnp.dot(z.astype(cd), w3_ref[...], preferred_element_type=jnp.float32) + b3_ref[...]
    )                                     # (T, 128) f32
    logits = (jnp.dot(h2.astype(cd), w4_ref[...], preferred_element_type=jnp.float32)
              + b4_ref[...])              # (T, 196) f32

    recon_ref[...] = jax.nn.sigmoid(logits).astype(recon_ref.dtype)
    head_ref[...] = head.astype(head_ref.dtype)


def vae_forward(x_nchw, eps1, eps2, params, *, tile_b=1024,
                compute_dtype=jnp.bfloat16, out_dtype=None):
    """x_nchw: (B, 1, 14, 14) float32.
    Returns (recon (B,196) out_dtype, mu (B,8) f32, std (B,8) f32)."""
    if out_dtype is None:
        out_dtype = compute_dtype
    B = x_nchw.shape[0]
    x = x_nchw.reshape(B, D_IN)                           # torch x.view(-1, 196); no pad, no cast
    eps = (eps1 + eps2).astype(jnp.float32)               # pre-sum the two noise draws (f32)

    (w1, b1, w21, b21, w22, b22, w3, b3, w4, b4) = params
    w1c = w1.astype(compute_dtype)                                     # (196, 128)
    wh = jnp.concatenate([w21, w22], axis=1).astype(compute_dtype)     # (128, 16)
    w3c = w3.astype(compute_dtype)                                     # (8, 128)
    w4c = w4.astype(compute_dtype)                                     # (128, 196)
    b1f = b1.astype(jnp.float32)
    bhf = jnp.concatenate([b21, b22], axis=1).astype(jnp.float32)      # (1, 16)
    b3f = b3.astype(jnp.float32)
    b4f = b4.astype(jnp.float32)

    # Tile the batch: multiple of 8 sublanes, big enough for ~85%+ of HBM
    # roofline, and capped so the grid has >= 2 steps when possible
    # (keeps both v7x TensorCores busy; near-free on 1-TC v5e/v6e).
    tile_b = max(8, min(tile_b,
                        _round_up(B, 8),
                        _round_up(-(-B // 2), 8)))
    grid = (pl.cdiv(B, tile_b),)

    def act_spec(d):
        return pl.BlockSpec((tile_b, d), lambda i: (i, 0))

    def resident_spec(shape):
        # constant block index across the grid -> weight stays in VMEM, no re-DMA
        return pl.BlockSpec(shape, lambda i: (0, 0))

    out_itemsize = jnp.dtype(out_dtype).itemsize
    weight_bytes = sum(int(a.size) * a.dtype.itemsize
                       for a in (w1c, wh, w3c, w4c, b1f, bhf, b3f, b4f))
    cost = pl.CostEstimate(
        flops=2 * B * (D_IN * D_H + D_H * D_Z2 + D_Z * D_H + D_H * D_IN),
        transcendentals=B * (D_H + D_H + D_IN),
        bytes_accessed=B * (D_IN * 4 + D_Z * 4 + D_IN * out_itemsize + D_Z2 * 4)
                       + weight_bytes,
    )

    recon, head = pl.pallas_call(
        _vae_kernel,
        grid=grid,
        in_specs=[
            act_spec(D_IN),                # x        (tile_b, 196) f32
            act_spec(D_Z),                 # eps      (tile_b, 8)   f32
            resident_spec((D_IN, D_H)),    # w1
            resident_spec((1, D_H)),       # b1
            resident_spec((D_H, D_Z2)),    # w_head
            resident_spec((1, D_Z2)),      # b_head
            resident_spec((D_Z, D_H)),     # w3
            resident_spec((1, D_H)),       # b3
            resident_spec((D_H, D_IN)),    # w4
            resident_spec((1, D_IN)),      # b4
        ],
        out_specs=(act_spec(D_IN), act_spec(D_Z2)),
        out_shape=(
            jax.ShapeDtypeStruct((B, D_IN), out_dtype),    # recon, full-extent 196-wide block
            jax.ShapeDtypeStruct((B, D_Z2), jnp.float32),  # [mu | std]
        ),
        compiler_params=pltpu.CompilerParams(
            dimension_semantics=("parallel",),   # shard batch over v7x's 2 TCs
        ),
        cost_estimate=cost,
    )(x, eps, w1c, b1f, wh, bhf, w3c, b3f, w4c, b4f)

    mu = head[:, :D_Z]
    std = head[:, D_Z:]
    return recon, mu, std


def init_params(key):
    """Deterministic init mimicking nn.Linear default (uniform +-1/sqrt(fan_in)).
    Weights stored as (in, out); biases as (1, out)."""
    def linear(key, fan_in, fan_out):
        kw, kb = jax.random.split(key)
        bound = 1.0 / jnp.sqrt(fan_in)
        w = jax.random.uniform(kw, (fan_in, fan_out), jnp.float32, -bound, bound)
        b = jax.random.uniform(kb, (1, fan_out), jnp.float32, -bound, bound)
        return w, b

    k1, k21, k22, k3, k4 = jax.random.split(key, 5)
    w1, b1 = linear(k1, D_IN, D_H)
    w21, b21 = linear(k21, D_H, D_Z)
    w22, b22 = linear(k22, D_H, D_Z)
    w3, b3 = linear(k3, D_Z, D_H)
    w4, b4 = linear(k4, D_H, D_IN)
    return (w1, b1, w21, b21, w22, b22, w3, b3, w4, b4)


if __name__ == "__main__":
    key = jax.random.PRNGKey(0)
    k_params, k_x, k_e1, k_e2 = jax.random.split(key, 4)

    B = 8
    x = jax.random.normal(k_x, (B, 1, 14, 14), jnp.float32)   # NCHW
    # torch.randn_like(std) equivalents, generated deterministically in-script
    eps1 = jax.random.normal(k_e1, (B, D_Z), jnp.float32)
    eps2 = jax.random.normal(k_e2, (B, D_Z), jnp.float32)
    params = init_params(k_params)

    fwd = jax.jit(vae_forward,
                  static_argnames=("tile_b", "compute_dtype", "out_dtype"))

    # strict-correctness path (f32 matmuls, f32 recon)
    recon32, mu32, std32 = jax.block_until_ready(
        fwd(x, eps1, eps2, params, compute_dtype=jnp.float32))
    # fast path (bf16 matmul inputs + bf16 recon store, f32 accumulation)
    recon16, mu16, std16 = jax.block_until_ready(
        fwd(x, eps1, eps2, params, compute_dtype=jnp.bfloat16))

    # pure-JAX reference matching the PyTorch module exactly
    hi = jax.lax.Precision.HIGHEST
    xf = x.reshape(B, D_IN)
    w1, b1, w21, b21, w22, b22, w3, b3, w4, b4 = params
    h = jnp.tanh(jnp.dot(xf, w1, precision=hi) + b1)
    mu_r = jnp.dot(h, w21, precision=hi) + b21
    std_r = jnp.dot(h, w22, precision=hi) + b22
    z_r = 0.5 * (eps1 * std_r + mu_r + (eps2 * std_r + mu_r))
    h2 = jnp.tanh(jnp.dot(z_r, w3, precision=hi) + b3)
    recon_r = jax.nn.sigmoid(jnp.dot(h2, w4, precision=hi) + b4)

    assert recon32.shape == (B, D_IN) and mu32.shape == (B, D_Z) and std32.shape == (B, D_Z)
    assert jnp.allclose(recon32, recon_r, atol=5e-3)
    assert jnp.allclose(mu32, mu_r, atol=5e-3)
    assert jnp.allclose(std32, std_r, atol=5e-3)
    # bf16 matmul inputs / bf16 recon: loose tolerance
    assert jnp.allclose(recon16.astype(jnp.float32), recon_r, atol=5e-2, rtol=5e-2)
    assert jnp.allclose(mu16, mu_r, atol=5e-2, rtol=5e-2)
    assert jnp.allclose(std16, std_r, atol=5e-2, rtol=5e-2)

    print("KERNEL_OK")
</pallas_src>

<mosaic_0001>
module attributes {stable_mosaic.version = 11 : i64} {
  func.func @_vae_kernel(%arg0: i32, %arg1: memref<8x196xf32, #tpu.memory_space<vmem>>, %arg2: memref<8x8xf32, #tpu.memory_space<vmem>>, %arg3: memref<196x128xf32, #tpu.memory_space<vmem>>, %arg4: memref<1x128xf32, #tpu.memory_space<vmem>>, %arg5: memref<128x16xf32, #tpu.memory_space<vmem>>, %arg6: memref<1x16xf32, #tpu.memory_space<vmem>>, %arg7: memref<8x128xf32, #tpu.memory_space<vmem>>, %arg8: memref<1x128xf32, #tpu.memory_space<vmem>>, %arg9: memref<128x196xf32, #tpu.memory_space<vmem>>, %arg10: memref<1x196xf32, #tpu.memory_space<vmem>>, %arg11: memref<8x196xf32, #tpu.memory_space<vmem>>, %arg12: memref<8x16xf32, #tpu.memory_space<vmem>>) attributes {dimension_semantics = [#tpu.dimension_semantics<parallel>], iteration_bounds = array<i64: 1>, scalar_prefetch = 0 : i64, scratch_operands = 0 : i64, tpu.core_type = #tpu.core_type<tc>, window_params = [{transform_indices = @transform_0, window_bounds = array<i64: 8, 196>}, {transform_indices = @transform_1, window_bounds = array<i64: 8, 8>}, {pipeline_mode = #tpu.pipeline_mode<synchronous>, transform_indices = @transform_2, window_bounds = array<i64: 196, 128>}, {pipeline_mode = #tpu.pipeline_mode<synchronous>, transform_indices = @transform_3, window_bounds = array<i64: 1, 128>}, {pipeline_mode = #tpu.pipeline_mode<synchronous>, transform_indices = @transform_4, window_bounds = array<i64: 128, 16>}, {pipeline_mode = #tpu.pipeline_mode<synchronous>, transform_indices = @transform_5, window_bounds = array<i64: 1, 16>}, {pipeline_mode = #tpu.pipeline_mode<synchronous>, transform_indices = @transform_6, window_bounds = array<i64: 8, 128>}, {pipeline_mode = #tpu.pipeline_mode<synchronous>, transform_indices = @transform_7, window_bounds = array<i64: 1, 128>}, {pipeline_mode = #tpu.pipeline_mode<synchronous>, transform_indices = @transform_8, window_bounds = array<i64: 128, 196>}, {pipeline_mode = #tpu.pipeline_mode<synchronous>, transform_indices = @transform_9, window_bounds = array<i64: 1, 196>}, {transform_indices = @transform_10, window_bounds = array<i64: 8, 196>}, {transform_indices = @transform_11, window_bounds = array<i64: 8, 16>}]} {
    %c0 = arith.constant 0 : index
    %c0_0 = arith.constant 0 : index
    %0 = vector.load %arg1[%c0, %c0_0] : memref<8x196xf32, #tpu.memory_space<vmem>>, vector<8x196xf32>
    %c0_1 = arith.constant 0 : index
    %c0_2 = arith.constant 0 : index
    %1 = vector.load %arg3[%c0_1, %c0_2] : memref<196x128xf32, #tpu.memory_space<vmem>>, vector<196x128xf32>
    %cst = arith.constant dense<0.000000e+00> : vector<8x128xf32>
    %2 = tpu.matmul %0, %1, %cst {dimension_numbers = #tpu.dot_dimension_numbers<[1], [0], [0], [1], [0, 0, 1, 1], [], []>} : vector<8x196xf32>, vector<196x128xf32>, vector<8x128xf32> -> vector<8x128xf32>
    %c0_3 = arith.constant 0 : index
    %c0_4 = arith.constant 0 : index
    %3 = vector.load %arg4[%c0_3, %c0_4] : memref<1x128xf32, #tpu.memory_space<vmem>>, vector<1x128xf32>
    %4 = vector.broadcast %3 : vector<1x128xf32> to vector<8x128xf32>
    %5 = arith.addf %2, %4 : vector<8x128xf32>
    %6 = math.tanh %5 : vector<8x128xf32>
    %c0_5 = arith.constant 0 : index
    %c0_6 = arith.constant 0 : index
    %7 = vector.load %arg5[%c0_5, %c0_6] : memref<128x16xf32, #tpu.memory_space<vmem>>, vector<128x16xf32>
    %cst_7 = arith.constant dense<0.000000e+00> : vector<8x16xf32>
    %8 = tpu.matmul %6, %7, %cst_7 {dimension_numbers = #tpu.dot_dimension_numbers<[1], [0], [0], [1], [0, 0, 1, 1], [], []>} : vector<8x128xf32>, vector<128x16xf32>, vector<8x16xf32> -> vector<8x16xf32>
    %c0_8 = arith.constant 0 : index
    %c0_9 = arith.constant 0 : index
    %9 = vector.load %arg6[%c0_8, %c0_9] : memref<1x16xf32, #tpu.memory_space<vmem>>, vector<1x16xf32>
    %10 = vector.broadcast %9 : vector<1x16xf32> to vector<8x16xf32>
    %11 = arith.addf %8, %10 : vector<8x16xf32>
    %12 = vector.extract_strided_slice %11 {offsets = [0, 0], sizes = [8, 8], strides = [1, 1]} : vector<8x16xf32> to vector<8x8xf32>
    %13 = vector.extract_strided_slice %11 {offsets = [0, 8], sizes = [8, 8], strides = [1, 1]} : vector<8x16xf32> to vector<8x8xf32>
    %c0_10 = arith.constant 0 : index
    %c0_11 = arith.constant 0 : index
    %14 = vector.load %arg2[%c0_10, %c0_11] : memref<8x8xf32, #tpu.memory_space<vmem>>, vector<8x8xf32>
    %cst_12 = arith.constant 5.000000e-01 : f32
    %15 = vector.broadcast %cst_12 : f32 to vector<8x8xf32>
    %16 = arith.mulf %15, %14 : vector<8x8xf32>
    %17 = arith.mulf %16, %13 : vector<8x8xf32>
    %18 = arith.addf %12, %17 : vector<8x8xf32>
    %c0_13 = arith.constant 0 : index
    %c0_14 = arith.constant 0 : index
    %19 = vector.load %arg7[%c0_13, %c0_14] : memref<8x128xf32, #tpu.memory_space<vmem>>, vector<8x128xf32>
    %cst_15 = arith.constant dense<0.000000e+00> : vector<8x128xf32>
    %20 = tpu.matmul %18, %19, %cst_15 {dimension_numbers = #tpu.dot_dimension_numbers<[1], [0], [0], [1], [0, 0, 1, 1], [], []>} : vector<8x8xf32>, vector<8x128xf32>, vector<8x128xf32> -> vector<8x128xf32>
    %c0_16 = arith.constant 0 : index
    %c0_17 = arith.constant 0 : index
    %21 = vector.load %arg8[%c0_16, %c0_17] : memref<1x128xf32, #tpu.memory_space<vmem>>, vector<1x128xf32>
    %22 = vector.broadcast %21 : vector<1x128xf32> to vector<8x128xf32>
    %23 = arith.addf %20, %22 : vector<8x128xf32>
    %24 = math.tanh %23 : vector<8x128xf32>
    %c0_18 = arith.constant 0 : index
    %c0_19 = arith.constant 0 : index
    %25 = vector.load %arg9[%c0_18, %c0_19] : memref<128x196xf32, #tpu.memory_space<vmem>>, vector<128x196xf32>
    %cst_20 = arith.constant dense<0.000000e+00> : vector<8x196xf32>
    %26 = tpu.matmul %24, %25, %cst_20 {dimension_numbers = #tpu.dot_dimension_numbers<[1], [0], [0], [1], [0, 0, 1, 1], [], []>} : vector<8x128xf32>, vector<128x196xf32>, vector<8x196xf32> -> vector<8x196xf32>
    %c0_21 = arith.constant 0 : index
    %c0_22 = arith.constant 0 : index
    %27 = vector.load %arg10[%c0_21, %c0_22] : memref<1x196xf32, #tpu.memory_space<vmem>>, vector<1x196xf32>
    %28 = vector.broadcast %27 : vector<1x196xf32> to vector<8x196xf32>
    %29 = arith.addf %26, %28 : vector<8x196xf32>
    %30 = arith.negf %29 : vector<8x196xf32>
    %31 = math.exp %30 : vector<8x196xf32>
    %cst_23 = arith.constant 1.000000e+00 : f32
    %32 = vector.broadcast %cst_23 : f32 to vector<8x196xf32>
    %33 = arith.addf %32, %31 : vector<8x196xf32>
    %34 = arith.divf %32, %33 : vector<8x196xf32>
    %c0_24 = arith.constant 0 : index
    %c0_25 = arith.constant 0 : index
    %35 = vector.load %arg11[%c0_24, %c0_25] : memref<8x196xf32, #tpu.memory_space<vmem>>, vector<8x196xf32>
    tpu.vector_store %arg11[%c0_24, %c0_25], %34 {strides = array<i32>} : memref<8x196xf32, #tpu.memory_space<vmem>>, vector<8x196xf32>,
    %c0_26 = arith.constant 0 : index
    %c0_27 = arith.constant 0 : index
    %36 = vector.load %arg12[%c0_26, %c0_27] : memref<8x16xf32, #tpu.memory_space<vmem>>, vector<8x16xf32>
    tpu.vector_store %arg12[%c0_26, %c0_27], %11 {strides = array<i32>} : memref<8x16xf32, #tpu.memory_space<vmem>>, vector<8x16xf32>,
    return
  }
  func.func @transform_0(%arg0: i32) -> (i32, i32) {
    %c0_i32 = arith.constant 0 : i32
    %c0_i32_0 = arith.constant 0 : i32
    return %arg0, %c0_i32 : i32, i32
  }
  func.func @transform_1(%arg0: i32) -> (i32, i32) {
    %c0_i32 = arith.constant 0 : i32
    %c0_i32_0 = arith.constant 0 : i32
    return %arg0, %c0_i32 : i32, i32
  }
  func.func @transform_2(%arg0: i32) -> (i32, i32) {
    %c0_i32 = arith.constant 0 : i32
    %c0_i32_0 = arith.constant 0 : i32
    %c0_i32_1 = arith.constant 0 : i32
    return %c0_i32, %c0_i32_0 : i32, i32
  }
  func.func @transform_3(%arg0: i32) -> (i32, i32) {
    %c0_i32 = arith.constant 0 : i32
    %c0_i32_0 = arith.constant 0 : i32
    %c0_i32_1 = arith.constant 0 : i32
    return %c0_i32, %c0_i32_0 : i32, i32
  }
  func.func @transform_4(%arg0: i32) -> (i32, i32) {
    %c0_i32 = arith.constant 0 : i32
    %c0_i32_0 = arith.constant 0 : i32
    %c0_i32_1 = arith.constant 0 : i32
    return %c0_i32, %c0_i32_0 : i32, i32
  }
  func.func @transform_5(%arg0: i32) -> (i32, i32) {
    %c0_i32 = arith.constant 0 : i32
    %c0_i32_0 = arith.constant 0 : i32
    %c0_i32_1 = arith.constant 0 : i32
    return %c0_i32, %c0_i32_0 : i32, i32
  }
  func.func @transform_6(%arg0: i32) -> (i32, i32) {
    %c0_i32 = arith.constant 0 : i32
    %c0_i32_0 = arith.constant 0 : i32
    %c0_i32_1 = arith.constant 0 : i32
    return %c0_i32, %c0_i32_0 : i32, i32
  }
  func.func @transform_7(%arg0: i32) -> (i32, i32) {
    %c0_i32 = arith.constant 0 : i32
    %c0_i32_0 = arith.constant 0 : i32
    %c0_i32_1 = arith.constant 0 : i32
    return %c0_i32, %c0_i32_0 : i32, i32
  }
  func.func @transform_8(%arg0: i32) -> (i32, i32) {
    %c0_i32 = arith.constant 0 : i32
    %c0_i32_0 = arith.constant 0 : i32
    %c0_i32_1 = arith.constant 0 : i32
    return %c0_i32, %c0_i32_0 : i32, i32
  }
  func.func @transform_9(%arg0: i32) -> (i32, i32) {
    %c0_i32 = arith.constant 0 : i32
    %c0_i32_0 = arith.constant 0 : i32
    %c0_i32_1 = arith.constant 0 : i32
    return %c0_i32, %c0_i32_0 : i32, i32
  }
  func.func @transform_10(%arg0: i32) -> (i32, i32) {
    %c0_i32 = arith.constant 0 : i32
    %c0_i32_0 = arith.constant 0 : i32
    return %arg0, %c0_i32 : i32, i32
  }
  func.func @transform_11(%arg0: i32) -> (i32, i32) {
    %c0_i32 = arith.constant 0 : i32
    %c0_i32_0 = arith.constant 0 : i32
    return %arg0, %c0_i32 : i32, i32
  }
}

</mosaic_0001>

<bundles_post_ra>
// kernel: vae_forward.1
= control target key start
LH: loop header
LB: loop body
LE: loop exit
PB: predicated region body
PF: predicated region fallthrough
CT: control target
= control target key end

     0   :  { %v684_v3 = vmov 0.0|0.0   ;;  %vm72_vm0 = vcmask 556032   ;;  %s1029_s0 = inlined_call_operand.vmem [shape: f32[8,196], index: 0, kind: input, shape index: {}]   ;;  %s1030_s1 = inlined_call_operand.vmem [shape: f32[8,8], index: 1, kind: input, shape index: {}]   ;;  %s1031_s2 = inlined_call_operand.vmem [shape: f32[196,128], index: 2, kind: input, shape index: {}]   ;;  %s1032_s3 = inlined_call_operand.vmem [shape: f32[1,128], index: 3, kind: input, shape index: {}]   ;;  %s1033_s4 = inlined_call_operand.vmem [shape: f32[128,16], index: 4, kind: input, shape index: {}]   ;;  %s1034_s5 = inlined_call_operand.vmem [shape: f32[1,16], index: 5, kind: input, shape index: {}]   ;;  %s1035_s6 = inlined_call_operand.vmem [shape: f32[8,128], index: 6, kind: input, shape index: {}]   ;;  %s1036_s7 = inlined_call_operand.vmem [shape: f32[1,128], index: 7, kind: input, shape index: {}]   ;;  %s1037_s8 = inlined_call_operand.vmem [shape: f32[128,196], index: 8, kind: input, shape index: {}]   ;;  %s1038_s9 = inlined_call_operand.vmem [shape: f32[1,196], index: 9, kind: input, shape index: {}]   ;;  %s1039_s10 = inlined_call_operand.hbm [shape: f32[8,196], index: 10, kind: output, shape index: {0}]   ;;  %s1040_s11 = inlined_call_operand.vmem [shape: f32[8,16], index: 11, kind: output, shape index: {1}]  }
   0x1   :  { %v40_v0 = vld [vmem:[%s1031_s2] sm:$0xff]  ;;  %v41_v1 = vld [vmem:[%s1031_s2 + $0x8] sm:$0xff]  ;;  %v42_v2 = vld [vmem:[%s1031_s2 + $0x10] sm:$0xff]  ;;  %551 = vmatprep.subr.bf16.mxu0 %v684_v3  ;;  %587 = vmatprep.subr.bf16.mxu1 %v684_v3 }
   0x2   :  { %v552_v4 = vpack.c.bf16 %v41_v1, %v40_v0  ;;  %v43_v5 = vld [vmem:[%s1031_s2 + $0x18] sm:$0xff]  ;;  %v44_v7 = vld [vmem:[%s1031_s2 + $0x20] sm:$0xff]  ;;  %v45_v8 = vld [vmem:[%s1031_s2 + $0x28] sm:$0xff] }
   0x3   :  { %v555_v6 = vpack.c.bf16 %v43_v5, %v42_v2  ;;  %v558_v9 = vpack.c.bf16 %v45_v8, %v44_v7  ;;  %v46_v10 = vld [vmem:[%s1031_s2 + $0x30] sm:$0xff]  ;;  %v47_v11 = vld [vmem:[%s1031_s2 + $0x38] sm:$0xff]  ;;  %v39_v12 = vld [vmem:[%s1029_s0 + $0x8] sm:$0xff] }
   0x4   :  { %553 = vmatpush1.bf16.msra.mxu0 %v552_v4  ;;  %486 = vmatprep.mubr.msk.f32.mxu0 %vm72_vm0, %v39_v12  ;;  %v151_v13 = vld [vmem:[%s1033_s4] sm:$0xff]  ;;  %v152_v14 = vld [vmem:[%s1033_s4 + $0x8] sm:$0xff]  ;;  %v153_v15 = vld [vmem:[%s1033_s4 + $0x10] sm:$0xff]  ;;  %v561_v18 = vpack.c.bf16 %v47_v11, %v46_v10 }
   0x5   :  { %554 = vmatprep.subr.bf16.mxu0 %v684_v3  ;;  %v588_v16 = vpack.c.bf16 %v152_v14, %v151_v13  ;;  %v154_v17 = vld [vmem:[%s1033_s4 + $0x18] sm:$0xff]  ;;  %v48_v19 = vld [vmem:[%s1031_s2 + $0x40] sm:$0xff]  ;;  %v49_v20 = vld [vmem:[%s1031_s2 + $0x48] sm:$0xff] }
   0x6   :  { %v591_v21 = vpack.c.bf16 %v154_v17, %v153_v15 }
   0x7   :  { %589 = vmatpush3.bf16.msra.mxu1 %v588_v16 }
   0x8   :  { %556 = vmatpush1.bf16.msra.mxu0 %v555_v6 }
   0x9   :  { %557 = vmatprep.subr.bf16.mxu0 %v684_v3 }
   0xc   :  { %559 = vmatpush1.bf16.msra.mxu0 %v558_v9 }
   0xd   :  { %560 = vmatprep.subr.bf16.mxu0 %v684_v3 }
   0xe   :  { %17 = vsyncpa [#allocation3], 0  ;;  %590 = vmatprep.subr.bf16.mxu1 %v684_v3  ;;  %v155_v22 = vld [vmem:[%s1033_s4 + $0x20] sm:$0xff]  ;;  %v156_v23 = vld [vmem:[%s1033_s4 + $0x28] sm:$0xff]  ;;  %v564_v24 = vpack.c.bf16 %v49_v20, %v48_v19  ;;  %v685_v53 = vmov 0.0   ;;  %vm76_vm1 = vcmask 1043456  }
   0xf   :  { %v50_v25 = vld [vmem:[%s1031_s2 + $0x50] sm:$0xff]  ;;  %v51_v26 = vld [vmem:[%s1031_s2 + $0x58] sm:$0xff]  ;;  %592 = vmatpush3.bf16.msra.mxu1 %v591_v21  ;;  %v594_v27 = vpack.c.bf16 %v156_v23, %v155_v22  ;;  %v52_v31 = vld [vmem:[%s1031_s2 + $0x60] sm:$0xff]  ;;  %vm686_vm2 = vmmov 0   ;;  %vm464_vm3 = vcmask 130048   ;;  %s687_s15 = smov 120  }
  0x10   :  { %562 = vmatpush1.bf16.msra.mxu0 %v561_v18  ;;  %593 = vmatprep.subr.bf16.mxu1 %v684_v3  ;;  %v157_v28 = vld [vmem:[%s1033_s4 + $0x30] sm:$0xff]  ;;  %v158_v29 = vld [vmem:[%s1033_s4 + $0x38] sm:$0xff]  ;;  %v567_v30 = vpack.c.bf16 %v51_v26, %v50_v25  ;;  %v53_v32 = vld [vmem:[%s1031_s2 + $0x68] sm:$0xff]  ;;  %vm260_vm4 = vcmask 64512  }
  0x11   :  { %563 = vmatprep.subr.bf16.mxu0 %v684_v3  ;;  %v597_v33 = vpack.c.bf16 %v158_v29, %v157_v28  ;;  %v159_v34 = vld [vmem:[%s1033_s4 + $0x40] sm:$0xff]  ;;  %v160_v35 = vld [vmem:[%s1033_s4 + $0x48] sm:$0xff]  ;;  %v570_v36 = vpack.c.bf16 %v53_v32, %v52_v31  ;;  %v54_v37 = vld [vmem:[%s1031_s2 + $0x70] sm:$0xff]  ;;  %543 = vmatprep.mubr.msk.f32.mxu1 %vm686_vm2, %v685_v53 }
  0x12   :  { %v55_v38 = vld [vmem:[%s1031_s2 + $0x78] sm:$0xff]  ;;  %v600_v39 = vpack.c.bf16 %v160_v35, %v159_v34  ;;  %v56_v41 = vld [vmem:[%s1031_s2 + $0x80] sm:$0xff]  ;;  %v57_v42 = vld [vmem:[%s1031_s2 + $0x88] sm:$0xff] }
  0x13   :  { %595 = vmatpush3.bf16.msra.mxu1 %v594_v27  ;;  %v573_v40 = vpack.c.bf16 %v55_v38, %v54_v37  ;;  %v576_v43 = vpack.c.bf16 %v57_v42, %v56_v41  ;;  %v58_v44 = vld [vmem:[%s1031_s2 + $0x90] sm:$0xff]  ;;  %v59_v45 = vld [vmem:[%s1031_s2 + $0x98] sm:$0xff]  ;;  %v60_v47 = vld [vmem:[%s1031_s2 + $0xa0] sm:$0xff] }
  0x14   :  { %565 = vmatpush1.bf16.msra.mxu0 %v564_v24  ;;  %596 = vmatprep.subr.bf16.mxu1 %v684_v3  ;;  %v579_v46 = vpack.c.bf16 %v59_v45, %v58_v44  ;;  %v61_v48 = vld [vmem:[%s1031_s2 + $0xa8] sm:$0xff]  ;;  %v62_v50 = vld [vmem:[%s1031_s2 + $0xb0] sm:$0xff]  ;;  %v63_v51 = vld [vmem:[%s1031_s2 + $0xb8] sm:$0xff] }
  0x15   :  { %566 = vmatprep.subr.bf16.mxu0 %v684_v3  ;;  %v582_v49 = vpack.c.bf16 %v61_v48, %v60_v47  ;;  %v585_v52 = vpack.c.bf16 %v63_v51, %v62_v50  ;;  %v64_v54 = vld [vmem:[%s1031_s2 + $0xc0] sm:$0xf]  ;;  %v161_v56 = vld [vmem:[%s1033_s4 + $0x50] sm:$0xff]  ;;  %v162_v57 = vld [vmem:[%s1033_s4 + $0x58] sm:$0xff] }
  0x16   :  { %v38_v55 = vld [vmem:[%s1029_s0] sm:$0xff]  ;;  %v603_v58 = vpack.c.bf16 %v162_v57, %v161_v56  ;;  %v164_v60 = vld [vmem:[%s1033_s4 + $0x68] sm:$0xff]  ;;  %v165_v62 = vld [vmem:[%s1033_s4 + $0x70] sm:$0xff] }
  0x17   :  { %598 = vmatpush3.bf16.msra.mxu1 %v597_v33  ;;  %v163_v59 = vld [vmem:[%s1033_s4 + $0x60] sm:$0xff]  ;;  %v166_v63 = vld [vmem:[%s1033_s4 + $0x78] sm:$0xff]  ;;  %v337_v11 = vld [vmem:[%s1037_s8 + $0x10] sm:$0xff] }
  0x18   :  { %568 = vmatpush1.bf16.msra.mxu0 %v567_v30  ;;  %599 = vmatprep.subr.bf16.mxu1 %v684_v3  ;;  %v606_v61 = vpack.c.bf16 %v164_v60, %v163_v59  ;;  %v609_v0 = vpack.c.bf16 %v166_v63, %v165_v62  ;;  %v484_v1 = vld [vmem:[%s1032_s3] ss:$0 sm:$0xff]  ;;  %v338_v8 = vld [vmem:[%s1037_s8 + $0x18] sm:$0xff]  ;;  %v340_v12 = vld [vmem:[%s1037_s8 + $0x28] sm:$0xff] }
  0x19   :  { %569 = vmatprep.subr.bf16.mxu0 %v684_v3  ;;  %v252_v7 = vld [vmem:[%s1035_s6] sm:$0xff]  ;;  %v342_v13 = vld [vmem:[%s1037_s8 + $0x38] sm:$0xff]  ;;  %v341_v17 = vld [vmem:[%s1037_s8 + $0x30] sm:$0xff] }
  0x1a   :  { %v335_v9 = vld [vmem:[%s1037_s8] sm:$0xff]  ;;  %v615_v15 = vpack.c.bf16 %v342_v13, %v340_v12  ;;  %v344_v18 = vld [vmem:[%s1037_s8 + $0x48] sm:$0xff]  ;;  %v346_v19 = vld [vmem:[%s1037_s8 + $0x58] sm:$0xff] }
  0x1b   :  { %601 = vmatpush3.bf16.msra.mxu1 %v600_v39  ;;  %v613_v14 = vpack.c.bf16 %v337_v11, %v335_v9  ;;  %v339_v16 = vld [vmem:[%s1037_s8 + $0x20] sm:$0xff]  ;;  %v619_v22 = vpack.c.bf16 %v346_v19, %v344_v18  ;;  %v345_v24 = vld [vmem:[%s1037_s8 + $0x50] sm:$0xff]  ;;  %v348_v26 = vld [vmem:[%s1037_s8 + $0x68] sm:$0xff] }
  0x1c   :  { %571 = vmatpush1.bf16.msra.mxu0 %v570_v36  ;;  %602 = vmatprep.subr.bf16.mxu1 %v684_v3  ;;  %v487_v20 = vld [vmem:[%s1034_s5] ss:$0 sm:$0xff]  ;;  %v617_v21 = vpack.c.bf16 %v341_v17, %v339_v16  ;;  %v350_v27 = vld [vmem:[%s1037_s8 + $0x78] sm:$0xff]  ;;  %v349_v33 = vld [vmem:[%s1037_s8 + $0x70] sm:$0xff] }
  0x1d   :  { %572 = vmatprep.subr.bf16.mxu0 %v684_v3  ;;  %v343_v23 = vld [vmem:[%s1037_s8 + $0x40] sm:$0xff]  ;;  %v623_v31 = vpack.c.bf16 %v350_v27, %v348_v26  ;;  %v352_v34 = vld [vmem:[%s1037_s8 + $0x88] sm:$0xff]  ;;  %v354_v35 = vld [vmem:[%s1037_s8 + $0x98] sm:$0xff] }
  0x1e   :  { %v621_v30 = vpack.c.bf16 %v345_v24, %v343_v23  ;;  %v347_v32 = vld [vmem:[%s1037_s8 + $0x60] sm:$0xff]  ;;  %v627_v37 = vpack.c.bf16 %v354_v35, %v352_v34  ;;  %v353_v39 = vld [vmem:[%s1037_s8 + $0x90] sm:$0xff]  ;;  %v358_v47 = vld [vmem:[%s1037_s8 + $0xb8] sm:$0xff] }
  0x1f   :  { %604 = vmatpush3.bf16.msra.mxu1 %v603_v58  ;;  %v625_v36 = vpack.c.bf16 %v349_v33, %v347_v32  ;;  %v351_v38 = vld [vmem:[%s1037_s8 + $0x80] sm:$0xff]  ;;  %v357_v50 = vld [vmem:[%s1037_s8 + $0xb0] sm:$0xff]  ;;  %v364_v57 = vld [vmem:[%s1037_s8 + $0xe8] sm:$0xff] }
  0x20   :  { %574 = vmatpush1.bf16.msra.mxu0 %v573_v40  ;;  %605 = vmatprep.subr.bf16.mxu1 %v684_v3  ;;  %v629_v40 = vpack.c.bf16 %v353_v39, %v351_v38  ;;  %v244_v41 = vld [vmem:[%s1030_s1] sm:$0xff]  ;;  %v361_v56 = vld [vmem:[%s1037_s8 + $0xd0] sm:$0xff]  ;;  %v366_v58 = vld [vmem:[%s1037_s8 + $0xf8] sm:$0xff] }
  0x21   :  { %575 = vmatprep.subr.bf16.mxu0 %v684_v3  ;;  %v245_v42 = vmul.f32 0.5, %v244_v41  ;;  %v639_v60 = vpack.c.bf16 %v366_v58, %v364_v57  ;;  %v365_v62 = vld [vmem:[%s1037_s8 + $0xf0] sm:$0xff] }
  0x23   :  { %607 = vmatpush3.bf16.msra.mxu1 %v606_v61  ;;  %v363_v61 = vld [vmem:[%s1037_s8 + $0xe0] sm:$0xff] }
  0x24   :  { %577 = vmatpush1.bf16.msra.mxu0 %v576_v43  ;;  %608 = vmatprep.subr.bf16.mxu1 %v684_v3  ;;  %v641_v63 = vpack.c.bf16 %v365_v62, %v363_v61 }
  0x25   :  { %578 = vmatprep.subr.bf16.mxu0 %v684_v3 }
  0x27   :  { %610 = vmatpush3.bf16.msra.mxu1 %v609_v0  ;;  %v488_v0 = vld [vmem:[%s1036_s7] ss:$0 sm:$0xff]  ;;  %s688_s7 = smov [#allocation2]  }
  0x28   :  { %580 = vmatpush1.bf16.msra.mxu0 %v579_v46  ;;  %v356_v46 = vld [vmem:[%s1037_s8 + $0xa8] sm:$0xff]  ;;  %s472_s26 = sshll.u32 %s688_s7, 4  ;;  %s473_s26 = int_to_ptr.vmem [resolvable:$true] %s472_s26 }
  0x29   :  { %581 = vmatprep.subr.bf16.mxu0 %v684_v3  ;;  %v631_v48 = vpack.c.bf16 %v358_v47, %v356_v46  ;;  %p665_p1 = scmp.lt.s32.totalorder %s473_s26, %s473_s26 }
  0x2c   :  { %583 = vmatpush1.bf16.msra.mxu0 %v582_v49  ;;  %v355_v49 = vld [vmem:[%s1037_s8 + $0xa0] sm:$0xff] }
  0x2d   :  { %584 = vmatprep.subr.bf16.mxu0 %v684_v3  ;;  %v336_v3 = vld [vmem:[%s1037_s8 + $0x8] sm:$0xff]  ;;  %v633_v51 = vpack.c.bf16 %v357_v50, %v355_v49 }
  0x2e   :  { %v611_v10 = vpack.c.bf16 %v338_v8, %v336_v3  ;;  %v367_v8 = vld [vmem:[%s1038_s9] sm:$0x3]  ;;  %s660_s9 = scalar_lea.vmem %s473_s26, 256 }
  0x2f   :  { %p661_p0 = scmp.ne.s32.totalorder %s473_s26, %s660_s9  ;;  %p666_p2 = scmp.lt.s32.totalorder %s660_s9, %s660_s9 }
  0x30   :  { %586 = vmatpush1.bf16.msra.mxu0 %v585_v52  ;;  %612 = vmatprep.subr.bf16.mxu1 %v611_v10  ;;  %v360_v52 = vld [vmem:[%s1037_s8 + $0xc8] sm:$0xff] }
  0x31   :  { %128 = vmatprep.subr.mxu0 %v685_v53  ;;  %p667_p3 = por %p666_p2, %p665_p1 }
  0x33   :  { %p668_p4 = pnand %p667_p3, %p661_p0 }
  0x34   :  { %485 = vmatpush1.msk.msra.mxu0 %vm76_vm1, %v64_v54  ;;  %v359_v54 = vld [vmem:[%s1037_s8 + $0xc0] sm:$0xff] }
  0x35   :  { %145 = vmatmul.mubr.f32.vlgmr.msra.gmra.mrb[0].mxu0 %v38_v55  ;;  %546 = vmatprep.subr.mxu0 %v685_v53  ;;  %v637_v59 = vpack.c.bf16 %v361_v56, %v359_v54 }
  0x36   :  { %548 = vmatprep.mubr.msk.f32.mxu0 %vm686_vm2, %v685_v53  ;;  %547 = vmatpush3.msra.mxu0 %v252_v7 }
 0x108   :  { %v146_v2 = vpop.f32.mrb[0].mxu0 }
 0x109   :  { %v147_v4 = vadd.f32 %v484_v1, %v146_v2  ;;  %v148_v5 = vpop.f32.mrb[1].mxu0 }
 0x10b   :  { %648 = vtanh.f32 %v147_v4 }
 0x115   :  { %v649_v6 = vpop.eup %648 }
 0x116   :  { %544 = vmatmul.mubr.f32.vlgmr.msra.gmra.mrb[0].mxu1 %v649_v6  ;;  %v369_v6 = vlaneseq }
 0x117   :  { %443 = vmatprep.mubr.f32.mxu1 %v685_v53  ;;  %614 = vmatpush1.bf16.msra.mxu1 %v613_v14  ;;  %v362_v53 = vld [vmem:[%s1037_s8 + $0xd8] sm:$0xff] }
 0x118   :  { %616 = vmatprep.subr.bf16.mxu1 %v615_v15  ;;  %v635_v55 = vpack.c.bf16 %v362_v53, %v360_v52  ;;  %v370_v7 = vshrl.u32 %v369_v6, 7 }
 0x11a   :  { %v371_v3 = vsub.s32 0, %v370_v7  ;;  %v375_v9 = vsub.s32 1, %v370_v7 }
 0x11b   :  { %618 = vmatpush1.bf16.msra.mxu1 %v617_v21 }
 0x11c   :  { %620 = vmatprep.subr.bf16.mxu1 %v619_v22  ;;  %v372_v10 = vrot.slane %v367_v8, %v371_v3  ;;  %v376_v11 = vrot.slane %v367_v8, %v375_v9 }
 0x11f   :  { %622 = vmatpush1.bf16.msra.mxu1 %v621_v30 }
 0x120   :  { %624 = vmatprep.subr.bf16.mxu1 %v623_v31 }
 0x123   :  { %626 = vmatpush1.bf16.msra.mxu1 %v625_v36 }
 0x124   :  { %628 = vmatprep.subr.bf16.mxu1 %v627_v37 }
 0x127   :  { %630 = vmatpush1.bf16.msra.mxu1 %v629_v40 }
 0x128   :  { %632 = vmatprep.subr.bf16.mxu1 %v631_v48 }
 0x12b   :  { %634 = vmatpush1.bf16.msra.mxu1 %v633_v51 }
 0x12c   :  { %636 = vmatprep.subr.bf16.mxu1 %v635_v55 }
 0x12f   :  { %638 = vmatpush1.bf16.msra.mxu1 %v637_v59 }
 0x130   :  { %640 = vmatprep.subr.bf16.mxu1 %v639_v60 }
 0x133   :  { %642 = vmatpush1.bf16.msra.mxu1 %v641_v63 }
 0x1e9   :  { %v240_v25 = vpop.f32.mrb[0].mxu1 }
 0x1ea   :  { %v241_v28 = vadd.f32 %v487_v20, %v240_v25  ;;  %v545_v29 = vpop.f32.mrb[1].mxu1 }
 0x1ec   :  { %465 = vst.msk [vmem:[%s1040_s11] sm:$0xff] %vm464_vm3, %v241_v28  ;;  %247 = vrot.lane.b32.xlu0 %v241_v28, %s687_s15 }
 0x25e   :  { %v248_v43 = vpop.permute.xlu0 %247 }
 0x25f   :  { %v250_v44 = vmul.f32 %v248_v43, %v245_v42 }
 0x261   :  { %v251_v45 = vadd.f32 %v250_v44, %v241_v28 }
 0x263   :  { %549 = vmatmul.mubr.msk.f32.vlgmr.msra.gmra.mrb[2].mxu0 %vm260_vm4, %v251_v45 }
 0x336   :  { %v330_v1 = vpop.f32.mrb[2].mxu0 }
 0x337   :  { %v331_v2 = vadd.f32 %v488_v0, %v330_v1  ;;  %v550_v4 = vpop.f32.mrb[3].mxu0 }
 0x339   :  { %650 = vtanh.f32 %v331_v2 }
 0x343   :  { %v651_v5 = vpop.eup %650 }
 0x344   :  { %444 = vmatmul.mubr.f32.vlgmr.msra.gmra.mrb[2].mxu1 %v651_v5 }
 0x417   :  { %v445_v12 = vpop.f32.mrb[2].mxu1 }
 0x418   :  { %v446_v13 = vadd.f32 %v445_v12, %v372_v10  ;;  %v447_v14 = vpop.f32.mrb[3].mxu1 }
 0x419   :  { %v448_v15 = vadd.f32 %v447_v14, %v376_v11 }
 0x41a   :  { %v490_v16 = vmul.f32 -1.442695, %v446_v13 }
 0x41b   :  { %v491_v17 = vmul.f32 -1.442695, %v448_v15 }
 0x41c   :  { %652 = vpow2.f32 %v490_v16 }
 0x41d   :  { %654 = vpow2.f32 %v491_v17 }
 0x426   :  { %v653_v18 = vpop.eup %652 }
 0x427   :  { %v655_v19 = vpop.eup %654  ;;  %v456_v20 = vadd.f32 1.0, %v653_v18 }
 0x428   :  { %v457_v21 = vadd.f32 1.0, %v655_v19 }
 0x429   :  { %656 = vrcp.f32 %v456_v20 }
 0x42a   :  { %658 = vrcp.f32 %v457_v21 }
 0x433   :  { %v657_v22 = vpop.eup %656 }
 0x434   :  { %v659_v23 = vpop.eup %658  ;;  %462 = vst [vmem:[#allocation2] sm:$0xff] %v657_v22 }
 0x435   :  { %463 = vst.msk [vmem:[#allocation2 + $0x8] sm:$0xff] %vm72_vm0, %v659_v23 }
 0x436   :  { %671 = shalt.err (!%p668_p4)
}
 0x437   :  { %s672_s28 = scalar_lea.hbm %s1039_s10, 256 }
 0x438   :  { %p673_p5 = scmp.ne.s32.totalorder %s1039_s10, %s672_s28  ;;  %p676_p6 = scmp.lt.u32.totalorder %s672_s28, %s1039_s10 }
 0x43a   :  { %p678_p7 = pnand %p676_p6, %p673_p5 }
 0x43c   :  { %681 = shalt.err (!%p678_p7)
}
 0x43d   :  { %475 = dma.vmem_to_hbm [thread:$0]  %s473_s26, 256, %s1039_s10, [#allocation3]  }
 0x43e   :  { %682 = dma.done.wait [#allocation3], 256  }
 0x43f   :  { %683 = vsyncadd [#allocation3], 4294967040 }
 0x440   :  { %483 = vsyncpa [#allocation3], 1 }

</bundles_post_ra>
